<compile_context>
chip_gen: v7x
topology: tpu7x:2x2x1
jax: 0.10.0
libtpu: 0.0.40
codegen_flags: <defaults>
</compile_context>

<pallas_src>
import math

import jax
import jax.numpy as jnp
from jax.experimental import pallas as pl
from jax.experimental.pallas import tpu as pltpu

_SQRT_2PI = math.sqrt(2.0 * math.pi)
_VMEM = pl.BlockSpec(memory_space=pltpu.MemorySpace.VMEM)


# ------------------------------ kernel bodies --------------------------------

def _gaussian_terms(mu_si, xx):
    """Shared per-row math in the natural [N, C] layout (no transposes anywhere)."""
    mu = mu_si[:, 0:1]                                        # [N, 1]
    si = jnp.maximum(mu_si[:, 1:2], jnp.float32(0.1))         # [N, 1] (clipped)
    norm = xx - mu
    # EUP reciprocal + one Newton-Raphson step: keeps the VALU slot free and is
    # accurate to ~1 ulp for si >= 0.1.
    inv_si = pl.reciprocal(si, approx=True)
    inv_si = inv_si * (jnp.float32(2.0) - si * inv_si)
    z = norm * inv_si
    values = jnp.float32(0.5) * (z * z) + jnp.log(si * jnp.float32(_SQRT_2PI))
    return values, norm, si


def _stats_kernel(mu_si_ref, xx_ref, stats_ref):
    """reduce=True / evaluate=True path: only 4 reduced scalars leave the chip.

    stats_ref (1, 4): [mean(values), sum(values), mean(|norm|), mean(si_clipped)]
    """
    values, norm, si = _gaussian_terms(
        mu_si_ref[...].astype(jnp.float32), xx_ref[...].astype(jnp.float32))
    inv_n = jnp.float32(1.0 / values.shape[0])
    sum_v = jnp.sum(values, axis=0, keepdims=True)            # (1, 1)
    stats_ref[0:1, 0:1] = sum_v * inv_n
    stats_ref[0:1, 1:2] = sum_v
    stats_ref[0:1, 2:3] = jnp.sum(jnp.abs(norm), axis=0, keepdims=True) * inv_n
    stats_ref[0:1, 3:4] = jnp.sum(si, axis=0, keepdims=True) * inv_n


def _values_kernel(mu_si_ref, xx_ref, values_ref):
    """reduce=False path: per-row loss values [N, 1] (matches the torch output shape)."""
    values, _, _ = _gaussian_terms(
        mu_si_ref[...].astype(jnp.float32), xx_ref[...].astype(jnp.float32))
    values_ref[...] = values


# ------------------------------ jitted wrappers -------------------------------

def _prep(outputs, targets):
    mu_si = jnp.asarray(outputs, jnp.float32)
    xx = jnp.asarray(targets, jnp.float32).reshape(mu_si.shape[0], 1)
    return mu_si, xx


def _stats_call(outputs, targets):
    mu_si, xx = _prep(outputs, targets)
    return pl.pallas_call(
        _stats_kernel,
        out_shape=jax.ShapeDtypeStruct((1, 4), jnp.float32),
        in_specs=[_VMEM, _VMEM],
        out_specs=_VMEM,
    )(mu_si, xx)


@jax.jit
def _loss_mean(outputs, targets):
    return _stats_call(outputs, targets)[0, 0]


@jax.jit
def _loss_sum(outputs, targets):
    return _stats_call(outputs, targets)[0, 1]


@jax.jit
def _loss_evaluate(outputs, targets):
    s = _stats_call(outputs, targets)
    return s[0, 2], s[0, 3]


@jax.jit
def _loss_values(outputs, targets):
    mu_si, xx = _prep(outputs, targets)
    n = mu_si.shape[0]
    return pl.pallas_call(
        _values_kernel,
        out_shape=jax.ShapeDtypeStruct((n, 1), jnp.float32),
        in_specs=[_VMEM, _VMEM],
        out_specs=_VMEM,
    )(mu_si, xx)


# --------------------------------- module ------------------------------------

class GaussianLoss:
    """JAX/Pallas port of monoloco GaussianLoss (no learnable parameters).

    The `device` argument is kept for API compatibility but unused.
    """

    def __init__(self, device=None, size_average=True, reduce=True, evaluate=False):
        self.size_average = size_average
        self.reduce = reduce
        self.evaluate = evaluate
        self.device = device

    def forward(self, outputs, targets):
        if self.evaluate:
            # TODO(synk): torch computes norm_si via numpy/.cpu() on host as a detached
            # diagnostic; here the same (mean|norm|, mean si) pair stays on-device.
            return _loss_evaluate(outputs, targets)
        if not self.reduce:
            return _loss_values(outputs, targets)        # [N, 1]
        if self.size_average:
            return _loss_mean(outputs, targets)
        return _loss_sum(outputs, targets)

    __call__ = forward


# --------------------------------- test --------------------------------------

def _ref(mu_si, xx):
    m = mu_si[:, 0:1]
    s = jnp.maximum(mu_si[:, 1:2], 0.1)
    norm = xx - m
    values = (norm / s) ** 2 / 2 + jnp.log(s * math.sqrt(2.0 * math.pi))
    return values, norm, s


if __name__ == "__main__":
    key = jax.random.PRNGKey(0)
    k1, k2, k3 = jax.random.split(key, 3)
    N = 8
    mu = jax.random.uniform(k1, (N, 1), jnp.float32, minval=1.0, maxval=10.0)
    si = jax.random.uniform(k2, (N, 1), jnp.float32, minval=0.05, maxval=1.5)  # some rows hit the 0.1 clip
    mu_si = jnp.concatenate([mu, si], axis=1)                                   # outputs [N, 2]
    xx = jax.random.uniform(k3, (N, 1), jnp.float32, minval=1.0, maxval=10.0)   # targets [N, 1]

    ref_vals, ref_norm, ref_si = _ref(mu_si, xx)

    loss_mean = GaussianLoss(device=None)(mu_si, xx)                       # default: mean
    loss_sum = GaussianLoss(device=None, size_average=False)(mu_si, xx)    # sum
    vals = GaussianLoss(device=None, reduce=False)(mu_si, xx)              # unreduced [N, 1]
    mean_norm, mean_si = GaussianLoss(device=None, evaluate=True)(mu_si, xx)

    jax.block_until_ready((loss_mean, loss_sum, vals, mean_norm, mean_si))

    assert jnp.allclose(loss_mean, jnp.mean(ref_vals), rtol=1e-3, atol=1e-3), (loss_mean, jnp.mean(ref_vals))
    assert jnp.allclose(loss_sum, jnp.sum(ref_vals), rtol=1e-3, atol=1e-3), (loss_sum, jnp.sum(ref_vals))
    assert vals.shape == (N, 1)
    assert jnp.allclose(vals, ref_vals, rtol=1e-3, atol=1e-3)
    assert jnp.allclose(mean_norm, jnp.mean(jnp.abs(ref_norm)), rtol=1e-3, atol=1e-3)
    assert jnp.allclose(mean_si, jnp.mean(ref_si), rtol=1e-3, atol=1e-3)

    print("KERNEL_OK")
</pallas_src>

<mosaic_0001>
module attributes {stable_mosaic.version = 11 : i64} {
  func.func @_stats_kernel(%arg0: memref<8x2xf32, #tpu.memory_space<vmem>>, %arg1: memref<8x1xf32, #tpu.memory_space<vmem>>, %arg2: memref<1x4xf32, #tpu.memory_space<vmem>>) attributes {dimension_semantics = [], scalar_prefetch = 0 : i64, scratch_operands = 0 : i64, tpu.core_type = #tpu.core_type<tc>} {
    %c0 = arith.constant 0 : index
    %c0_0 = arith.constant 0 : index
    %0 = vector.load %arg0[%c0, %c0_0] : memref<8x2xf32, #tpu.memory_space<vmem>>, vector<8x2xf32>
    %c0_1 = arith.constant 0 : index
    %c0_2 = arith.constant 0 : index
    %1 = vector.load %arg1[%c0_1, %c0_2] : memref<8x1xf32, #tpu.memory_space<vmem>>, vector<8x1xf32>
    %2 = vector.extract_strided_slice %0 {offsets = [0, 0], sizes = [8, 1], strides = [1, 1]} : vector<8x2xf32> to vector<8x1xf32>
    %3 = vector.extract_strided_slice %0 {offsets = [0, 1], sizes = [8, 1], strides = [1, 1]} : vector<8x2xf32> to vector<8x1xf32>
    %cst = arith.constant 1.000000e-01 : f32
    %4 = vector.broadcast %cst : f32 to vector<8x1xf32>
    %5 = arith.maximumf %3, %4 : vector<8x1xf32>
    %6 = arith.subf %1, %2 : vector<8x1xf32>
    %7 = tpu.reciprocal %5 {approx = true} : vector<8x1xf32> -> vector<8x1xf32>
    %8 = arith.mulf %5, %7 : vector<8x1xf32>
    %cst_3 = arith.constant 2.000000e+00 : f32
    %9 = vector.broadcast %cst_3 : f32 to vector<8x1xf32>
    %10 = arith.subf %9, %8 : vector<8x1xf32>
    %11 = arith.mulf %7, %10 : vector<8x1xf32>
    %12 = arith.mulf %6, %11 : vector<8x1xf32>
    %13 = arith.mulf %12, %12 : vector<8x1xf32>
    %cst_4 = arith.constant 5.000000e-01 : f32
    %14 = vector.broadcast %cst_4 : f32 to vector<8x1xf32>
    %15 = arith.mulf %14, %13 : vector<8x1xf32>
    %cst_5 = arith.constant 2.50662827 : f32
    %16 = vector.broadcast %cst_5 : f32 to vector<8x1xf32>
    %17 = arith.mulf %5, %16 : vector<8x1xf32>
    %18 = math.log %17 : vector<8x1xf32>
    %19 = arith.addf %15, %18 : vector<8x1xf32>
    %cst_6 = arith.constant dense<0.000000e+00> : vector<1xf32>
    %20 = vector.multi_reduction <add>, %19, %cst_6 [0] : vector<8x1xf32> to vector<1xf32>
    %21 = vector.shape_cast %20 : vector<1xf32> to vector<1x1xf32>
    %cst_7 = arith.constant 1.250000e-01 : f32
    %22 = vector.broadcast %cst_7 : f32 to vector<1x1xf32>
    %23 = arith.mulf %21, %22 : vector<1x1xf32>
    %c0_8 = arith.constant 0 : index
    %c0_9 = arith.constant 0 : index
    %24 = vector.load %arg2[%c0_8, %c0_9] : memref<1x4xf32, #tpu.memory_space<vmem>>, vector<1x1xf32>
    tpu.vector_store %arg2[%c0_8, %c0_9], %23 {strides = array<i32>} : memref<1x4xf32, #tpu.memory_space<vmem>>, vector<1x1xf32>,
    %c0_10 = arith.constant 0 : index
    %c1 = arith.constant 1 : index
    %25 = vector.load %arg2[%c0_10, %c1] : memref<1x4xf32, #tpu.memory_space<vmem>>, vector<1x1xf32>
    tpu.vector_store %arg2[%c0_10, %c1], %21 {strides = array<i32>} : memref<1x4xf32, #tpu.memory_space<vmem>>, vector<1x1xf32>,
    %26 = math.absf %6 : vector<8x1xf32>
    %cst_11 = arith.constant dense<0.000000e+00> : vector<1xf32>
    %27 = vector.multi_reduction <add>, %26, %cst_11 [0] : vector<8x1xf32> to vector<1xf32>
    %28 = vector.shape_cast %27 : vector<1xf32> to vector<1x1xf32>
    %cst_12 = arith.constant 1.250000e-01 : f32
    %29 = vector.broadcast %cst_12 : f32 to vector<1x1xf32>
    %30 = arith.mulf %28, %29 : vector<1x1xf32>
    %c0_13 = arith.constant 0 : index
    %c2 = arith.constant 2 : index
    %31 = vector.load %arg2[%c0_13, %c2] : memref<1x4xf32, #tpu.memory_space<vmem>>, vector<1x1xf32>
    tpu.vector_store %arg2[%c0_13, %c2], %30 {strides = array<i32>} : memref<1x4xf32, #tpu.memory_space<vmem>>, vector<1x1xf32>,
    %cst_14 = arith.constant dense<0.000000e+00> : vector<1xf32>
    %32 = vector.multi_reduction <add>, %5, %cst_14 [0] : vector<8x1xf32> to vector<1xf32>
    %33 = vector.shape_cast %32 : vector<1xf32> to vector<1x1xf32>
    %cst_15 = arith.constant 1.250000e-01 : f32
    %34 = vector.broadcast %cst_15 : f32 to vector<1x1xf32>
    %35 = arith.mulf %33, %34 : vector<1x1xf32>
    %c0_16 = arith.constant 0 : index
    %c3 = arith.constant 3 : index
    %36 = vector.load %arg2[%c0_16, %c3] : memref<1x4xf32, #tpu.memory_space<vmem>>, vector<1x1xf32>
    tpu.vector_store %arg2[%c0_16, %c3], %35 {strides = array<i32>} : memref<1x4xf32, #tpu.memory_space<vmem>>, vector<1x1xf32>,
    return
  }
}

</mosaic_0001>

<bundles_post_ra>
// kernel: _loss_mean.1
= control target key start
LH: loop header
LB: loop body
LE: loop exit
PB: predicated region body
PF: predicated region fallthrough
CT: control target
= control target key end

     0   :  { %s167_s0 = inlined_call_operand.vmem [shape: f32[8,2], index: 0, kind: input, shape index: {}]   ;;  %s168_s1 = inlined_call_operand.vmem [shape: f32[8,1], index: 1, kind: input, shape index: {}]   ;;  %s169_s2 = inlined_call_operand.hbm [shape: f32[1,4], index: 2, kind: output, shape index: {}]  }
   0x1   :  { %v12_v0 = vld [vmem:[%s167_s0] sm:$0xff] }
   0x2   :  { %7 = vsyncpa [#allocation3], 0  ;;  %v14_v1 = vmax.f32 %v12_v0, 0.1  ;;  %vm67_vm0 = vcmask 15368   ;;  %s128_s11 = smov 127  }
   0x3   :  { %s129_s0 = smov 2   ;;  %v13_v17 = vld [vmem:[%s168_s1] sm:$0xff]  ;;  %vm35_vm1 = vcmask 7168   ;;  %vm44_vm2 = vcmask 0   ;;  %s130_s1 = smov 1   ;;  %vm50_vm3 = vcmask 8200  }
   0x4   :  { %100 = vrcp.f32 %v14_v1  ;;  %v27_v2 = vmul.f32 2.5066283, %v14_v1  ;;  %v68_v8 = vsel %vm67_vm0, %v14_v1, 0.0  ;;  %v15_v18 = vsub.f32 %v13_v17, %v12_v0  ;;  %s131_s14 = smov [#allocation2]  }
   0x5   :  { %v69_v9 = vrot.slane %v68_v8, 4  ;;  %s88_s15 = sshll.u32 %s131_s14, 4  ;;  %vm65_vm4 = vcmask 16400   ;;  %vm80_vm5 = vcmask 24600   ;;  %s89_s15 = int_to_ptr.vmem [resolvable:$true] %s88_s15 }
   0x6   :  { %102 = vlog2.f32 %v27_v2  ;;  %v52_v19 = vand.u32 2147483647, %v15_v18  ;;  %s104_s16 = scalar_lea.vmem %s89_s15, 16  ;;  %s108_s17 = scalar_lea.vmem %s89_s15, 32 }
   0x7   :  { %v70_v11 = vadd.f32 %v69_v9, %v68_v8  ;;  %p105_p0 = scmp.ne.s32.totalorder %s89_s15, %s104_s16  ;;  %p109_p1 = scmp.lt.s32.totalorder %s89_s15, %s89_s15 }
   0x8   :  { %v53_v20 = vsel %vm35_vm1, %v52_v19, 0.0  ;;  %p110_p2 = scmp.lt.s32.totalorder %s108_s17, %s104_s16 }
   0x9   :  { %v71_v12 = vrot.slane %v70_v11, 2  ;;  %v54_v21 = vrot.slane %v53_v20, 4 }
   0xa   :  { %p111_p3 = por %p110_p2, %p109_p1 }
   0xb   :  { %v72_v13 = vadd.f32 %v71_v12, %v70_v11  ;;  %v55_v24 = vadd.f32 %v54_v21, %v53_v20 }
   0xc   :  { %p112_p4 = pnand %p111_p3, %p105_p0 }
   0xd   :  { %v73_v14 = vrot.slane %v72_v13, 1  ;;  %v56_v28 = vrot.slane %v55_v24, 2 }
   0xe   :  { %v101_v3 = vpop.eup %100 }
   0xf   :  { %v17_v4 = vmul.f32 %v101_v3, %v14_v1  ;;  %v74_v15 = vadd.f32 %v73_v14, %v72_v13  ;;  %v57_v32 = vadd.f32 %v56_v28, %v55_v24 }
  0x10   :  { %v103_v6 = vpop.eup %102 }
  0x11   :  { %v18_v5 = vsub.f32 2.0, %v17_v4  ;;  %v29_v10 = vmul.f32 0.6931472, %v103_v6  ;;  %v75_v16 = vmul.f32 0.125, %v74_v15  ;;  %v58_v35 = vrot.slane %v57_v32, 1 }
  0x13   :  { %v19_v7 = vmul.f32 %v101_v3, %v18_v5  ;;  %v59_v38 = vadd.f32 %v58_v35, %v57_v32 }
  0x15   :  { %21 = vrot.lane.b32.xlu0 %v19_v7, %s128_s11  ;;  %v60_v41 = vmul.f32 0.125, %v59_v38 }
  0x19   :  { %31 = vrot.lane.b32.xlu0 %v29_v10, %s128_s11 }
  0x1d   :  { %77 = vrot.lane.b32.xlu0 %v75_v16, %s129_s0 }
  0x87   :  { %v22_v22 = vpop.permute.xlu0 %21 }
  0x88   :  { %v24_v23 = vmul.f32 %v22_v22, %v15_v18 }
  0x8a   :  { %v25_v25 = vmul.f32 %v24_v23, %v24_v23 }
  0x8b   :  { %v32_v26 = vpop.permute.xlu0 %31 }
  0x8c   :  { %v26_v27 = vmul.f32 0.5, %v25_v25 }
  0x8e   :  { %v34_v29 = vadd.f32 %v32_v26, %v26_v27 }
  0x8f   :  { %v78_v43 = vpop.permute.xlu0 %77 }
  0x90   :  { %v36_v30 = vsel %vm35_vm1, %v34_v29, 0.0 }
  0x91   :  { %v37_v31 = vrot.slane %v36_v30, 4 }
  0x93   :  { %v38_v33 = vadd.f32 %v37_v31, %v36_v30 }
  0x95   :  { %v39_v34 = vrot.slane %v38_v33, 2 }
  0x97   :  { %v40_v36 = vadd.f32 %v39_v34, %v38_v33 }
  0x99   :  { %v41_v37 = vrot.slane %v40_v36, 1 }
  0x9b   :  { %v42_v39 = vadd.f32 %v41_v37, %v40_v36 }
  0x9d   :  { %47 = vrot.lane.b32.xlu1 %v42_v39, %s130_s1  ;;  %v43_v40 = vmul.f32 0.125, %v42_v39 }
  0x9f   :  { %45 = vst.msk [vmem:[#allocation2] sm:$0x1] %vm44_vm2, %v43_v40 }
  0xa1   :  { %62 = vrot.lane.b32.xlu1 %v60_v41, %s129_s0 }
 0x10f   :  { %v48_v42 = vpop.permute.xlu1 %47 }
 0x110   :  { %51 = vst.msk [vmem:[#allocation2] sm:$0x1] %vm50_vm3, %v48_v42 }
 0x113   :  { %v63_v44 = vpop.permute.xlu1 %62 }
 0x114   :  { %66 = vst.msk [vmem:[#allocation2] sm:$0x1] %vm65_vm4, %v63_v44 }
 0x115   :  { %81 = vst.msk [vmem:[#allocation2] sm:$0x1] %vm80_vm5, %v78_v43 }
 0x116   :  { %115 = shalt.err (!%p112_p4)
}
 0x117   :  { %s116_s20 = scalar_lea.hbm %s169_s2, 16 }
 0x118   :  { %p117_p5 = scmp.ne.s32.totalorder %s169_s2, %s116_s20  ;;  %p120_p6 = scmp.lt.u32.totalorder %s116_s20, %s169_s2 }
 0x11a   :  { %p122_p7 = pnand %p120_p6, %p117_p5 }
 0x11c   :  { %125 = shalt.err (!%p122_p7)
}
 0x11d   :  { %91 = dma.vmem_to_hbm [thread:$0]  %s89_s15, 16, %s169_s2, [#allocation3]  }
 0x11e   :  { %126 = dma.done.wait [#allocation3], 16  }
 0x11f   :  { %127 = vsyncadd [#allocation3], 4294967280 }
 0x120   :  { %95 = vsyncpa [#allocation3], 1 }

</bundles_post_ra>
